<compile_context>
chip_gen: v7x
topology: tpu7x:2x2x1
jax: 0.10.0
libtpu: 0.0.40
codegen_flags: <defaults>
</compile_context>

<pallas_src>
import functools

import jax
import jax.numpy as jnp
from jax import lax
from jax.experimental import pallas as pl
from jax.experimental.pallas import tpu as pltpu


def _make_divisible(v, divisor, min_value=None):
    if min_value is None:
        min_value = divisor
    new_v = max(min_value, int(v + divisor / 2) // divisor * divisor)
    if new_v < 0.9 * v:
        new_v += divisor
    return new_v


def _round_up(x, m):
    return (x + m - 1) // m * m


def _pick_vmem_limit_bytes():
    """~3/4 of physical VMEM per generation (96 MiB on v5e/v6e, 48 MiB on v7x)."""
    try:
        cap = pltpu.get_tpu_info().vmem_capacity_bytes
    except Exception:
        cap = 64 * 1024 * 1024
    return int(min(cap * 3 // 4, 100 * 1024 * 1024))


def _fused_mbconv_kernel(*refs, W, hw_pad, hw_valid, use_se, identity, inv_hw):
    if use_se:
        (x_ref, m_ref, w1_ref, b1_ref, fw1_ref, fb1_ref,
         fw2_ref, fb2_ref, w2_ref, b2_ref, o_ref) = refs
    else:
        x_ref, m_ref, w1_ref, b1_ref, w2_ref, b2_ref, o_ref = refs

    x_f32 = x_ref[0]                               # (inp, hw_pad) f32, lane-dense
    xb = x_f32.astype(jnp.bfloat16)
    c_in = xb.shape[0]

    # Zero-extend the flat pixel axis on both ends so every tap shift is a
    # static in-bounds lane slice (no circular wrap to reason about).
    pad = W + 1
    zpad = jnp.zeros((c_in, pad), jnp.bfloat16)
    xz = jnp.concatenate([zpad, xb, zpad], axis=1)  # (inp, hw_pad + 2W + 2) bf16

    # 0/1 boundary masks (precomputed on host): kill the taps that would read the
    # zero padding row/column of the 3x3 conv.
    row_m = (m_ref[0:1, :], None, m_ref[1:2, :])    # kh = 0 / 1 / 2
    col_m = (m_ref[2:3, :], None, m_ref[3:4, :])    # kw = 0 / 1 / 2

    # ---- in-kernel im2col: 9 lane-shifted, masked views -> one MXU dot ----
    taps = []
    for kh in range(3):
        for kw in range(3):
            d = (kh - 1) * W + (kw - 1)
            xs = xz[:, pad + d: pad + d + hw_pad]   # (inp, hw_pad) shifted view
            if row_m[kh] is not None:
                xs = xs * row_m[kh]
            if col_m[kw] is not None:
                xs = xs * col_m[kw]
            taps.append(xs)
    patches = jnp.concatenate(taps, axis=0)         # (9*inp, hw_pad) bf16, VMEM only

    # 3x3 conv (BN1 scale folded into w1) + bias + SiLU, f32 accumulation.
    h = jnp.dot(w1_ref[...], patches, preferred_element_type=jnp.float32)
    h = h + b1_ref[...]                              # (c_exp, hw_pad) + (c_exp, 1)
    h = h * jax.nn.sigmoid(h)                        # SiLU in f32 (VPU + EUP)

    # ---- Squeeze-Excite (refs only exist when use_se) ----
    if use_se:
        h_pool = h * m_ref[4:5, :] if hw_pad != hw_valid else h
        pooled = jnp.sum(h_pool, axis=1, keepdims=True) * inv_hw       # (c_exp, 1)
        y = jnp.dot(fw1_ref[...], pooled.astype(jnp.bfloat16),
                    preferred_element_type=jnp.float32) + fb1_ref[...]
        y = y * jax.nn.sigmoid(y)
        g = jnp.dot(fw2_ref[...], y.astype(jnp.bfloat16),
                    preferred_element_type=jnp.float32) + fb2_ref[...]
        g = jax.nn.sigmoid(g)                                           # (c_exp, 1)
        h = h * g

    # ---- 1x1 conv (BN2 scale folded) ----
    out = jnp.dot(w2_ref[...], h.astype(jnp.bfloat16),
                  preferred_element_type=jnp.float32)
    out = out + b2_ref[...]                                             # (oup, hw_pad)

    # ---- exact f32 residual from the same loaded x block ----
    if identity:
        out = out + x_f32

    o_ref[...] = out[None].astype(o_ref.dtype)


def fused_mbconv_forward(x_nchw, p, *, inp, oup, stride, expansion, use_se):
    # Per the reference module, the 3x3 conv is always stride=1 / pad=1; `stride`
    # only decides whether the residual connection is used.
    assert stride in (1, 2)
    c_exp = round(inp * expansion)
    identity = (stride == 1 and inp == oup)
    eps = 1e-5

    B, C, H, W = x_nchw.shape
    assert C == inp
    hw = H * W
    hw_pad = _round_up(hw, 128)        # lane-dense output stores even for odd hw
    padded = hw_pad != hw

    # Raw f32 x, channels-major flat pixels (free reshape of contiguous NCHW).
    x = x_nchw.astype(jnp.float32).reshape(B, inp, hw)
    if padded:
        x = jnp.pad(x, ((0, 0), (0, 0), (0, hw_pad - hw)))

    # Boundary masks for the in-kernel 3x3 taps (tiny, built once on the host).
    pix = jnp.arange(hw, dtype=jnp.int32)
    row, col = pix // W, pix % W
    masks = jnp.stack([
        row != 0,                        # kh == 0 taps read the top pad row
        row != H - 1,                    # kh == 2 taps read the bottom pad row
        col != 0,                        # kw == 0 taps read the left pad column
        col != W - 1,                    # kw == 2 taps read the right pad column
        jnp.ones((hw,), bool),           # valid-pixel mask (SE pool when hw padded)
    ], axis=0).astype(jnp.bfloat16)
    if padded:
        masks = jnp.pad(masks, ((0, 0), (0, hw_pad - hw)))

    # ---- fold BatchNorm into conv weights (host side, once) ----
    s1 = p['bn1_gamma'] / jnp.sqrt(p['bn1_var'] + eps)
    b1 = (p['bn1_beta'] - p['bn1_mean'] * s1).reshape(c_exp, 1).astype(jnp.float32)
    w1s = (p['w1'].reshape(9 * inp, c_exp).T * s1[:, None]).astype(jnp.bfloat16)
    s2 = p['bn2_gamma'] / jnp.sqrt(p['bn2_var'] + eps)
    b2 = (p['bn2_beta'] - p['bn2_mean'] * s2).reshape(oup, 1).astype(jnp.float32)
    w2s = (p['w2'].T * s2[:, None]).astype(jnp.bfloat16)

    kernel = functools.partial(_fused_mbconv_kernel, W=W, hw_pad=hw_pad,
                               hw_valid=hw, use_se=use_se, identity=identity,
                               inv_hw=1.0 / hw)

    in_specs = [
        pl.BlockSpec((1, inp, hw_pad), lambda b: (b, 0, 0)),     # raw f32 x
        pl.BlockSpec((5, hw_pad), lambda b: (0, 0)),             # boundary masks
        pl.BlockSpec((c_exp, 9 * inp), lambda b: (0, 0)),        # folded 3x3 conv w
        pl.BlockSpec((c_exp, 1), lambda b: (0, 0)),              # bn1 bias
    ]
    args = [x, masks, w1s, b1]
    if use_se:
        hidden = p['fc1_w'].shape[1]
        fc1_wt = p['fc1_w'].T.astype(jnp.bfloat16)               # (hidden, c_exp)
        fc1_b = p['fc1_b'].reshape(hidden, 1).astype(jnp.float32)
        fc2_wt = p['fc2_w'].T.astype(jnp.bfloat16)               # (c_exp, hidden)
        fc2_b = p['fc2_b'].reshape(c_exp, 1).astype(jnp.float32)
        in_specs += [
            pl.BlockSpec((hidden, c_exp), lambda b: (0, 0)),     # SE fc1 w^T (bf16)
            pl.BlockSpec((hidden, 1), lambda b: (0, 0)),         # SE fc1 b
            pl.BlockSpec((c_exp, hidden), lambda b: (0, 0)),     # SE fc2 w^T (bf16)
            pl.BlockSpec((c_exp, 1), lambda b: (0, 0)),          # SE fc2 b
        ]
        args += [fc1_wt, fc1_b, fc2_wt, fc2_b]
    in_specs += [
        pl.BlockSpec((oup, c_exp), lambda b: (0, 0)),            # folded 1x1 conv w
        pl.BlockSpec((oup, 1), lambda b: (0, 0)),                # bn2 bias
    ]
    args += [w2s, b2]

    out = pl.pallas_call(
        kernel,
        out_shape=jax.ShapeDtypeStruct((B, oup, hw_pad), jnp.float32),
        grid_spec=pltpu.PrefetchScalarGridSpec(
            num_scalar_prefetch=0,
            grid=(B,),
            in_specs=in_specs,
            out_specs=pl.BlockSpec((1, oup, hw_pad), lambda b: (b, 0, 0)),
        ),
        compiler_params=pltpu.CompilerParams(
            dimension_semantics=("parallel",),
            vmem_limit_bytes=_pick_vmem_limit_bytes(),
        ),
    )(*args)

    if padded:
        out = out[:, :, :hw]
    return out.reshape(B, oup, H, W)               # already NCHW


def make_params(key, inp, oup, expansion):
    c_exp = round(inp * expansion)
    hidden = _make_divisible(inp // 4, 8)
    ks = jax.random.split(key, 12)
    f32 = jnp.float32
    return {
        'w1': 0.1 * jax.random.normal(ks[0], (3, 3, inp, c_exp), f32),     # HWIO
        'bn1_gamma': 1.0 + 0.1 * jax.random.normal(ks[1], (c_exp,), f32),
        'bn1_beta': 0.1 * jax.random.normal(ks[2], (c_exp,), f32),
        'bn1_mean': 0.1 * jax.random.normal(ks[3], (c_exp,), f32),
        'bn1_var': jnp.abs(1.0 + 0.1 * jax.random.normal(ks[4], (c_exp,), f32)),
        'fc1_w': 0.1 * jax.random.normal(ks[5], (c_exp, hidden), f32),
        'fc1_b': 0.1 * jax.random.normal(ks[6], (hidden,), f32),
        'fc2_w': 0.1 * jax.random.normal(ks[7], (hidden, c_exp), f32),
        'fc2_b': 0.1 * jax.random.normal(ks[8], (c_exp,), f32),
        'w2': 0.1 * jax.random.normal(ks[9], (c_exp, oup), f32),           # (Cin, Cout)
        'bn2_gamma': 1.0 + 0.1 * jax.random.normal(ks[10], (oup,), f32),
        'bn2_beta': 0.1 * jax.random.normal(ks[11], (oup,), f32),
        'bn2_mean': jnp.zeros((oup,), f32),
        'bn2_var': jnp.ones((oup,), f32),
    }


def reference_forward(x_nchw, p, *, inp, oup, stride, expansion, use_se):
    eps = 1e-5
    identity = (stride == 1 and inp == oup)
    x = jnp.transpose(x_nchw, (0, 2, 3, 1)).astype(jnp.float32)
    h = lax.conv_general_dilated(x, p['w1'], (1, 1), 'SAME',
                                 dimension_numbers=('NHWC', 'HWIO', 'NHWC'))
    s1 = p['bn1_gamma'] / jnp.sqrt(p['bn1_var'] + eps)
    h = h * s1 + (p['bn1_beta'] - p['bn1_mean'] * s1)
    h = h * jax.nn.sigmoid(h)
    if use_se:
        pooled = jnp.mean(h, axis=(1, 2))
        y = pooled @ p['fc1_w'] + p['fc1_b']
        y = y * jax.nn.sigmoid(y)
        y = y @ p['fc2_w'] + p['fc2_b']
        y = jax.nn.sigmoid(y)
        h = h * y[:, None, None, :]
    out = jnp.einsum('bhwc,co->bhwo', h, p['w2'])
    s2 = p['bn2_gamma'] / jnp.sqrt(p['bn2_var'] + eps)
    out = out * s2 + (p['bn2_beta'] - p['bn2_mean'] * s2)
    if identity:
        out = out + x
    return jnp.transpose(out, (0, 3, 1, 2))


if __name__ == "__main__":
    key = jax.random.PRNGKey(0)

    configs = [
        # (inp, oup, stride, expansion, use_se, B, H, W)
        (4, 4, 1, 4, True, 2, 16, 16),     # identity residual + SE path
        (8, 16, 2, 4, False, 2, 32, 32),   # no residual, no SE
    ]
    for cfg_i, (inp, oup, stride, expansion, use_se, B, H, W) in enumerate(configs):
        key, k_x, k_p = jax.random.split(key, 3)
        x = jax.random.normal(k_x, (B, inp, H, W), jnp.float32)   # NCHW, like PyTorch
        params = make_params(k_p, inp, oup, expansion)

        out = fused_mbconv_forward(x, params, inp=inp, oup=oup, stride=stride,
                                   expansion=expansion, use_se=use_se)
        out = jax.block_until_ready(out)

        ref = reference_forward(x, params, inp=inp, oup=oup, stride=stride,
                                expansion=expansion, use_se=use_se)
        # bf16 MXU operands in the kernel vs f32 reference -> relaxed tolerance.
        if not bool(jnp.allclose(out, ref, rtol=2e-2, atol=2e-2)):
            err = float(jnp.max(jnp.abs(out - ref)))
            raise AssertionError(f"config {cfg_i}: Pallas output mismatch, max abs err {err}")

    print("KERNEL_OK")
</pallas_src>

<mosaic_0001>
module attributes {stable_mosaic.version = 11 : i64} {
  func.func @_fused_mbconv_kernel(%arg0: i32, %arg1: memref<1x4x256xf32, #tpu.memory_space<vmem>>, %arg2: memref<5x256xbf16, #tpu.memory_space<vmem>>, %arg3: memref<16x36xbf16, #tpu.memory_space<vmem>>, %arg4: memref<16x1xf32, #tpu.memory_space<vmem>>, %arg5: memref<8x16xbf16, #tpu.memory_space<vmem>>, %arg6: memref<8x1xf32, #tpu.memory_space<vmem>>, %arg7: memref<16x8xbf16, #tpu.memory_space<vmem>>, %arg8: memref<16x1xf32, #tpu.memory_space<vmem>>, %arg9: memref<4x16xbf16, #tpu.memory_space<vmem>>, %arg10: memref<4x1xf32, #tpu.memory_space<vmem>>, %arg11: memref<1x4x256xf32, #tpu.memory_space<vmem>>) attributes {dimension_semantics = [#tpu.dimension_semantics<parallel>], iteration_bounds = array<i64: 2>, scalar_prefetch = 0 : i64, scratch_operands = 0 : i64, tpu.core_type = #tpu.core_type<tc>, window_params = [{transform_indices = @transform_0, window_bounds = array<i64: 1, 4, 256>}, {pipeline_mode = #tpu.pipeline_mode<synchronous>, transform_indices = @transform_1, window_bounds = array<i64: 5, 256>}, {pipeline_mode = #tpu.pipeline_mode<synchronous>, transform_indices = @transform_2, window_bounds = array<i64: 16, 36>}, {pipeline_mode = #tpu.pipeline_mode<synchronous>, transform_indices = @transform_3, window_bounds = array<i64: 16, 1>}, {pipeline_mode = #tpu.pipeline_mode<synchronous>, transform_indices = @transform_4, window_bounds = array<i64: 8, 16>}, {pipeline_mode = #tpu.pipeline_mode<synchronous>, transform_indices = @transform_5, window_bounds = array<i64: 8, 1>}, {pipeline_mode = #tpu.pipeline_mode<synchronous>, transform_indices = @transform_6, window_bounds = array<i64: 16, 8>}, {pipeline_mode = #tpu.pipeline_mode<synchronous>, transform_indices = @transform_7, window_bounds = array<i64: 16, 1>}, {pipeline_mode = #tpu.pipeline_mode<synchronous>, transform_indices = @transform_8, window_bounds = array<i64: 4, 16>}, {pipeline_mode = #tpu.pipeline_mode<synchronous>, transform_indices = @transform_9, window_bounds = array<i64: 4, 1>}, {transform_indices = @transform_10, window_bounds = array<i64: 1, 4, 256>}]} {
    %c0 = arith.constant 0 : index
    %c0_0 = arith.constant 0 : index
    %c0_1 = arith.constant 0 : index
    %0 = vector.load %arg1[%c0, %c0_0, %c0_1] : memref<1x4x256xf32, #tpu.memory_space<vmem>>, vector<1x4x256xf32>
    %1 = vector.shape_cast %0 : vector<1x4x256xf32> to vector<4x256xf32>
    %2 = arith.truncf %1 : vector<4x256xf32> to vector<4x256xbf16>
    %cst = arith.constant 0.000000e+00 : bf16
    %3 = vector.broadcast %cst : bf16 to vector<4x17xbf16>
    %4 = tpu.concatenate %3, %2, %3 in 1 : vector<4x17xbf16>, vector<4x256xbf16>, vector<4x17xbf16> -> vector<4x290xbf16>
    %c0_2 = arith.constant 0 : index
    %c0_3 = arith.constant 0 : index
    %5 = vector.load %arg2[%c0_2, %c0_3] : memref<5x256xbf16, #tpu.memory_space<vmem>>, vector<1x256xbf16>
    %c1 = arith.constant 1 : index
    %c0_4 = arith.constant 0 : index
    %6 = vector.load %arg2[%c1, %c0_4] : memref<5x256xbf16, #tpu.memory_space<vmem>>, vector<1x256xbf16>
    %c2 = arith.constant 2 : index
    %c0_5 = arith.constant 0 : index
    %7 = vector.load %arg2[%c2, %c0_5] : memref<5x256xbf16, #tpu.memory_space<vmem>>, vector<1x256xbf16>
    %c3 = arith.constant 3 : index
    %c0_6 = arith.constant 0 : index
    %8 = vector.load %arg2[%c3, %c0_6] : memref<5x256xbf16, #tpu.memory_space<vmem>>, vector<1x256xbf16>
    %9 = vector.extract_strided_slice %4 {offsets = [0, 0], sizes = [4, 256], strides = [1, 1]} : vector<4x290xbf16> to vector<4x256xbf16>
    %10 = vector.broadcast %5 : vector<1x256xbf16> to vector<4x256xbf16>
    %11 = arith.mulf %9, %10 : vector<4x256xbf16>
    %12 = vector.broadcast %7 : vector<1x256xbf16> to vector<4x256xbf16>
    %13 = arith.mulf %11, %12 : vector<4x256xbf16>
    %14 = vector.extract_strided_slice %4 {offsets = [0, 1], sizes = [4, 256], strides = [1, 1]} : vector<4x290xbf16> to vector<4x256xbf16>
    %15 = vector.broadcast %5 : vector<1x256xbf16> to vector<4x256xbf16>
    %16 = arith.mulf %14, %15 : vector<4x256xbf16>
    %17 = vector.extract_strided_slice %4 {offsets = [0, 2], sizes = [4, 256], strides = [1, 1]} : vector<4x290xbf16> to vector<4x256xbf16>
    %18 = vector.broadcast %5 : vector<1x256xbf16> to vector<4x256xbf16>
    %19 = arith.mulf %17, %18 : vector<4x256xbf16>
    %20 = vector.broadcast %8 : vector<1x256xbf16> to vector<4x256xbf16>
    %21 = arith.mulf %19, %20 : vector<4x256xbf16>
    %22 = vector.extract_strided_slice %4 {offsets = [0, 16], sizes = [4, 256], strides = [1, 1]} : vector<4x290xbf16> to vector<4x256xbf16>
    %23 = vector.broadcast %7 : vector<1x256xbf16> to vector<4x256xbf16>
    %24 = arith.mulf %22, %23 : vector<4x256xbf16>
    %25 = vector.extract_strided_slice %4 {offsets = [0, 17], sizes = [4, 256], strides = [1, 1]} : vector<4x290xbf16> to vector<4x256xbf16>
    %26 = vector.extract_strided_slice %4 {offsets = [0, 18], sizes = [4, 256], strides = [1, 1]} : vector<4x290xbf16> to vector<4x256xbf16>
    %27 = vector.broadcast %8 : vector<1x256xbf16> to vector<4x256xbf16>
    %28 = arith.mulf %26, %27 : vector<4x256xbf16>
    %29 = vector.extract_strided_slice %4 {offsets = [0, 32], sizes = [4, 256], strides = [1, 1]} : vector<4x290xbf16> to vector<4x256xbf16>
    %30 = vector.broadcast %6 : vector<1x256xbf16> to vector<4x256xbf16>
    %31 = arith.mulf %29, %30 : vector<4x256xbf16>
    %32 = vector.broadcast %7 : vector<1x256xbf16> to vector<4x256xbf16>
    %33 = arith.mulf %31, %32 : vector<4x256xbf16>
    %34 = vector.extract_strided_slice %4 {offsets = [0, 33], sizes = [4, 256], strides = [1, 1]} : vector<4x290xbf16> to vector<4x256xbf16>
    %35 = vector.broadcast %6 : vector<1x256xbf16> to vector<4x256xbf16>
    %36 = arith.mulf %34, %35 : vector<4x256xbf16>
    %37 = vector.extract_strided_slice %4 {offsets = [0, 34], sizes = [4, 256], strides = [1, 1]} : vector<4x290xbf16> to vector<4x256xbf16>
    %38 = vector.broadcast %6 : vector<1x256xbf16> to vector<4x256xbf16>
    %39 = arith.mulf %37, %38 : vector<4x256xbf16>
    %40 = vector.broadcast %8 : vector<1x256xbf16> to vector<4x256xbf16>
    %41 = arith.mulf %39, %40 : vector<4x256xbf16>
    %42 = tpu.concatenate %13, %16, %21, %24, %25, %28, %33, %36, %41 in 0 : vector<4x256xbf16>, vector<4x256xbf16>, vector<4x256xbf16>, vector<4x256xbf16>, vector<4x256xbf16>, vector<4x256xbf16>, vector<4x256xbf16>, vector<4x256xbf16>, vector<4x256xbf16> -> vector<36x256xbf16>
    %c0_7 = arith.constant 0 : index
    %c0_8 = arith.constant 0 : index
    %43 = vector.load %arg3[%c0_7, %c0_8] : memref<16x36xbf16, #tpu.memory_space<vmem>>, vector<16x36xbf16>
    %cst_9 = arith.constant dense<0.000000e+00> : vector<16x256xf32>
    %44 = tpu.matmul %43, %42, %cst_9 {dimension_numbers = #tpu.dot_dimension_numbers<[1], [0], [0], [1], [0, 0, 1, 1], [], []>} : vector<16x36xbf16>, vector<36x256xbf16>, vector<16x256xf32> -> vector<16x256xf32>
    %c0_10 = arith.constant 0 : index
    %c0_11 = arith.constant 0 : index
    %45 = vector.load %arg4[%c0_10, %c0_11] : memref<16x1xf32, #tpu.memory_space<vmem>>, vector<16x1xf32>
    %46 = vector.broadcast %45 : vector<16x1xf32> to vector<16x256xf32>
    %47 = arith.addf %44, %46 : vector<16x256xf32>
    %48 = arith.negf %47 : vector<16x256xf32>
    %49 = math.exp %48 : vector<16x256xf32>
    %cst_12 = arith.constant 1.000000e+00 : f32
    %50 = vector.broadcast %cst_12 : f32 to vector<16x256xf32>
    %51 = arith.addf %50, %49 : vector<16x256xf32>
    %52 = arith.divf %50, %51 : vector<16x256xf32>
    %53 = arith.mulf %47, %52 : vector<16x256xf32>
    %cst_13 = arith.constant dense<0.000000e+00> : vector<16xf32>
    %54 = vector.multi_reduction <add>, %53, %cst_13 [1] : vector<16x256xf32> to vector<16xf32>
    %55 = vector.shape_cast %54 : vector<16xf32> to vector<16x1xf32>
    %cst_14 = arith.constant 3.906250e-03 : f32
    %56 = vector.broadcast %cst_14 : f32 to vector<16x1xf32>
    %57 = arith.mulf %55, %56 : vector<16x1xf32>
    %c0_15 = arith.constant 0 : index
    %c0_16 = arith.constant 0 : index
    %58 = vector.load %arg5[%c0_15, %c0_16] : memref<8x16xbf16, #tpu.memory_space<vmem>>, vector<8x16xbf16>
    %59 = arith.truncf %57 : vector<16x1xf32> to vector<16x1xbf16>
    %cst_17 = arith.constant dense<0.000000e+00> : vector<8x1xf32>
    %60 = tpu.matmul %58, %59, %cst_17 {dimension_numbers = #tpu.dot_dimension_numbers<[1], [0], [0], [1], [0, 0, 1, 1], [], []>} : vector<8x16xbf16>, vector<16x1xbf16>, vector<8x1xf32> -> vector<8x1xf32>
    %c0_18 = arith.constant 0 : index
    %c0_19 = arith.constant 0 : index
    %61 = vector.load %arg6[%c0_18, %c0_19] : memref<8x1xf32, #tpu.memory_space<vmem>>, vector<8x1xf32>
    %62 = arith.addf %60, %61 : vector<8x1xf32>
    %63 = arith.negf %62 : vector<8x1xf32>
    %64 = math.exp %63 : vector<8x1xf32>
    %cst_20 = arith.constant 1.000000e+00 : f32
    %65 = vector.broadcast %cst_20 : f32 to vector<8x1xf32>
    %66 = arith.addf %65, %64 : vector<8x1xf32>
    %67 = arith.divf %65, %66 : vector<8x1xf32>
    %68 = arith.mulf %62, %67 : vector<8x1xf32>
    %c0_21 = arith.constant 0 : index
    %c0_22 = arith.constant 0 : index
    %69 = vector.load %arg7[%c0_21, %c0_22] : memref<16x8xbf16, #tpu.memory_space<vmem>>, vector<16x8xbf16>
    %70 = arith.truncf %68 : vector<8x1xf32> to vector<8x1xbf16>
    %cst_23 = arith.constant dense<0.000000e+00> : vector<16x1xf32>
    %71 = tpu.matmul %69, %70, %cst_23 {dimension_numbers = #tpu.dot_dimension_numbers<[1], [0], [0], [1], [0, 0, 1, 1], [], []>} : vector<16x8xbf16>, vector<8x1xbf16>, vector<16x1xf32> -> vector<16x1xf32>
    %c0_24 = arith.constant 0 : index
    %c0_25 = arith.constant 0 : index
    %72 = vector.load %arg8[%c0_24, %c0_25] : memref<16x1xf32, #tpu.memory_space<vmem>>, vector<16x1xf32>
    %73 = arith.addf %71, %72 : vector<16x1xf32>
    %74 = arith.negf %73 : vector<16x1xf32>
    %75 = math.exp %74 : vector<16x1xf32>
    %cst_26 = arith.constant 1.000000e+00 : f32
    %76 = vector.broadcast %cst_26 : f32 to vector<16x1xf32>
    %77 = arith.addf %76, %75 : vector<16x1xf32>
    %78 = arith.divf %76, %77 : vector<16x1xf32>
    %79 = vector.broadcast %78 : vector<16x1xf32> to vector<16x256xf32>
    %80 = arith.mulf %53, %79 : vector<16x256xf32>
    %c0_27 = arith.constant 0 : index
    %c0_28 = arith.constant 0 : index
    %81 = vector.load %arg9[%c0_27, %c0_28] : memref<4x16xbf16, #tpu.memory_space<vmem>>, vector<4x16xbf16>
    %82 = arith.truncf %80 : vector<16x256xf32> to vector<16x256xbf16>
    %cst_29 = arith.constant dense<0.000000e+00> : vector<4x256xf32>
    %83 = tpu.matmul %81, %82, %cst_29 {dimension_numbers = #tpu.dot_dimension_numbers<[1], [0], [0], [1], [0, 0, 1, 1], [], []>} : vector<4x16xbf16>, vector<16x256xbf16>, vector<4x256xf32> -> vector<4x256xf32>
    %c0_30 = arith.constant 0 : index
    %c0_31 = arith.constant 0 : index
    %84 = vector.load %arg10[%c0_30, %c0_31] : memref<4x1xf32, #tpu.memory_space<vmem>>, vector<4x1xf32>
    %85 = vector.broadcast %84 : vector<4x1xf32> to vector<4x256xf32>
    %86 = arith.addf %83, %85 : vector<4x256xf32>
    %87 = arith.addf %86, %1 : vector<4x256xf32>
    %88 = vector.shape_cast %87 : vector<4x256xf32> to vector<1x4x256xf32>
    %c0_32 = arith.constant 0 : index
    %c0_33 = arith.constant 0 : index
    %c0_34 = arith.constant 0 : index
    %89 = vector.load %arg11[%c0_32, %c0_33, %c0_34] : memref<1x4x256xf32, #tpu.memory_space<vmem>>, vector<1x4x256xf32>
    tpu.vector_store %arg11[%c0_32, %c0_33, %c0_34], %88 {strides = array<i32>} : memref<1x4x256xf32, #tpu.memory_space<vmem>>, vector<1x4x256xf32>,
    return
  }
  func.func @transform_0(%arg0: i32) -> (i32, i32, i32) {
    %c0_i32 = arith.constant 0 : i32
    %c0_i32_0 = arith.constant 0 : i32
    %c0_i32_1 = arith.constant 0 : i32
    return %arg0, %c0_i32, %c0_i32_0 : i32, i32, i32
  }
  func.func @transform_1(%arg0: i32) -> (i32, i32) {
    %c0_i32 = arith.constant 0 : i32
    %c0_i32_0 = arith.constant 0 : i32
    %c0_i32_1 = arith.constant 0 : i32
    return %c0_i32, %c0_i32_0 : i32, i32
  }
  func.func @transform_2(%arg0: i32) -> (i32, i32) {
    %c0_i32 = arith.constant 0 : i32
    %c0_i32_0 = arith.constant 0 : i32
    %c0_i32_1 = arith.constant 0 : i32
    return %c0_i32, %c0_i32_0 : i32, i32
  }
  func.func @transform_3(%arg0: i32) -> (i32, i32) {
    %c0_i32 = arith.constant 0 : i32
    %c0_i32_0 = arith.constant 0 : i32
    %c0_i32_1 = arith.constant 0 : i32
    return %c0_i32, %c0_i32_0 : i32, i32
  }
  func.func @transform_4(%arg0: i32) -> (i32, i32) {
    %c0_i32 = arith.constant 0 : i32
    %c0_i32_0 = arith.constant 0 : i32
    %c0_i32_1 = arith.constant 0 : i32
    return %c0_i32, %c0_i32_0 : i32, i32
  }
  func.func @transform_5(%arg0: i32) -> (i32, i32) {
    %c0_i32 = arith.constant 0 : i32
    %c0_i32_0 = arith.constant 0 : i32
    %c0_i32_1 = arith.constant 0 : i32
    return %c0_i32, %c0_i32_0 : i32, i32
  }
  func.func @transform_6(%arg0: i32) -> (i32, i32) {
    %c0_i32 = arith.constant 0 : i32
    %c0_i32_0 = arith.constant 0 : i32
    %c0_i32_1 = arith.constant 0 : i32
    return %c0_i32, %c0_i32_0 : i32, i32
  }
  func.func @transform_7(%arg0: i32) -> (i32, i32) {
    %c0_i32 = arith.constant 0 : i32
    %c0_i32_0 = arith.constant 0 : i32
    %c0_i32_1 = arith.constant 0 : i32
    return %c0_i32, %c0_i32_0 : i32, i32
  }
  func.func @transform_8(%arg0: i32) -> (i32, i32) {
    %c0_i32 = arith.constant 0 : i32
    %c0_i32_0 = arith.constant 0 : i32
    %c0_i32_1 = arith.constant 0 : i32
    return %c0_i32, %c0_i32_0 : i32, i32
  }
  func.func @transform_9(%arg0: i32) -> (i32, i32) {
    %c0_i32 = arith.constant 0 : i32
    %c0_i32_0 = arith.constant 0 : i32
    %c0_i32_1 = arith.constant 0 : i32
    return %c0_i32, %c0_i32_0 : i32, i32
  }
  func.func @transform_10(%arg0: i32) -> (i32, i32, i32) {
    %c0_i32 = arith.constant 0 : i32
    %c0_i32_0 = arith.constant 0 : i32
    %c0_i32_1 = arith.constant 0 : i32
    return %arg0, %c0_i32, %c0_i32_0 : i32, i32, i32
  }
}

</mosaic_0001>

<bundles_post_ra>
// kernel: tpu_custom_call.1
= control target key start
LH: loop header
LB: loop body
LE: loop exit
PB: predicated region body
PF: predicated region fallthrough
CT: control target
= control target key end

     0   :  { %15 = vsyncpa [#allocation3], 0  ;;  %s1667_s0 = inlined_call_operand.vmem [shape: f32[2,4,256], index: 0, kind: input, shape index: {}]   ;;  %s1668_s1 = inlined_call_operand.vmem [shape: bf16[5,256], index: 1, kind: input, shape index: {}]   ;;  %s1669_s2 = inlined_call_operand.vmem [shape: bf16[16,36], index: 2, kind: input, shape index: {}]   ;;  %s1670_s3 = inlined_call_operand.vmem [shape: f32[16,1], index: 3, kind: input, shape index: {}]   ;;  %s1671_s4 = inlined_call_operand.vmem [shape: bf16[8,16], index: 4, kind: input, shape index: {}]   ;;  %s1672_s5 = inlined_call_operand.vmem [shape: f32[8,1], index: 5, kind: input, shape index: {}]   ;;  %s1673_s6 = inlined_call_operand.vmem [shape: bf16[16,8], index: 6, kind: input, shape index: {}]   ;;  %s1674_s7 = inlined_call_operand.vmem [shape: f32[16,1], index: 7, kind: input, shape index: {}]   ;;  %s1675_s8 = inlined_call_operand.vmem [shape: bf16[4,16], index: 8, kind: input, shape index: {}]   ;;  %s1676_s9 = inlined_call_operand.vmem [shape: f32[4,1], index: 9, kind: input, shape index: {}]   ;;  %s1677_s10 = inlined_call_operand.hbm [shape: f32[2,4,256], index: 10, kind: output, shape index: {}]  }
   0x1   :  { %17 = vsyncpa [#allocation3 + $0x1], 0  ;;  %s1389_s13 = smov 0   ;;  %s1391_s14 = smov 0  }
   0x2   :  { %s1393_s15 = smov 0   ;;  %s1395_s16 = smov 0  }
   0x3 LB: > { %s1410_s17 = sadd.s32 4294967295, %s1312_s16   ;;  %s1107_s18 = sadd.s32 4294967294, %s1312_s16   ;;  %s1312_s16 = sphi %s1395_s16, %s1683_s16   ;;  %s1308_s15 = sphi %s1393_s15, %s1682_s15   ;;  %s1304_s14 = sphi %s1391_s14, %s1681_s14   ;;  %s1300_s13 = sphi %s1389_s13, %s1680_s13  }
   0x4   : > { %s1414_s19 = sadd.s32 1, %s1312_s16   ;;  %s245_s20 = sadd.s32 1, %s1308_s15 }
   0x5   : > { %s242_s21 = ssub.s32 %s1312_s16, %s1414_s19  ;;  %p255_p0 = scmp.ne.s32.totalorder %s1308_s15, %s1304_s14 }
   0x6   : > { %p243_p1 = scmp.eq.s32.totalorder %s242_s21, 0  ;;  %p256_p2 = scmp.eq.s32.totalorder %s1410_s17, 1 }
   0x7   : > { %p261_p3 = scmp.ne.s32.totalorder %s1304_s14, %s1300_s13  ;;  %p262_p4 = scmp.eq.s32.totalorder %s1107_s18, 1 }
   0x8   : > { %s1425_s22 = scalar_select %p243_p1, %s1308_s15, %s245_s20  }
   0x9   : > { %p1427_p5 = por %p256_p2, %p255_p0  ;;  %p1431_p6 = por %p262_p4, %p261_p3 }
   0xa   : > { %p1110_p7 = scmp.ge.s32.totalorder %s1312_s16, 1  ;;  %p315_p8 = scmp.lt.s32.totalorder %s1312_s16, 3 }
   0xc   : > { %p316_p9 = pnand %p1110_p7, %p315_p8 }
   0xd   : > { %v382_v0 = vld [vmem:[%s1668_s1] sm:$0x11] (!%p316_p9)  ;;  %v392_v1 = vlaneseq (!%p316_p9)  ;;  %v383_v2 = vld [vmem:[%s1668_s1] sm:$0x22] (!%p316_p9)  ;;  %p353_p10 = scmp.lt.s32.totalorder (!%p316_p9), %s1410_s17, 1  ;;  %s1314_s20 = smov (!%p316_p9), 1  }
   0xe   : > { %319 = sbr.rel (%p316_p9) target bundleno = 1574 (0x626), region = 60  ;;  %v1114_v3 = vcombine.low (!%p316_p9), %v382_v0, %v382_v0  ;;  %v1115_v4 = vcombine.high (!%p316_p9), %v382_v0, %v382_v0  ;;  %v1117_v7 = vcombine.high (!%p316_p9), %v383_v2, %v383_v2  ;;  %v1116_v10 = vcombine.low (!%p316_p9), %v383_v2, %v383_v2  ;;  %s1315_s21 = smov (!%p316_p9), 2  }
   0xf   : > { %v393_v5 = vshrl.u32 (!%p316_p9), %v392_v1, 7  ;;  %s1316_s25 = smov (!%p316_p9), 17   ;;  %s1317_s26 = smov (!%p316_p9), 16   ;;  %vm371_vm0 = vcmask (!%p316_p9), 138240   ;;  %vm432_vm1 = vcmask (!%p316_p9), 7168   ;;  %vm497_vm2 = vcmask (!%p316_p9), 146432  }
  0x10   : > { %v390_v6 = vpack.i.b16 (!%p316_p9), %v1114_v3, %v1114_v3  ;;  %v397_v9 = vpack.i.b16 (!%p316_p9), %v1115_v4, %v1115_v4  ;;  %v459_v13 = vshrl.u32 (!%p316_p9), %v1117_v7, 16  ;;  %v452_v17 = vshrl.u32 (!%p316_p9), %v1116_v10, 16  ;;  %s1318_s27 = smov (!%p316_p9), 32   ;;  %s1319_s28 = smov (!%p316_p9), 18  }
  0x11   : > { %v394_v8 = vsub.s32 (!%p316_p9), 0, %v393_v5  ;;  %v415_v19 = vsub.s32 (!%p316_p9), 1, %v393_v5  ;;  %v418_v22 = vpack.i.b16 (!%p316_p9), %v1117_v7, %v1117_v7  ;;  %v411_v23 = vpack.i.b16 (!%p316_p9), %v1116_v10, %v1116_v10  ;;  %s1322_s11 = smov (!%p316_p9), 111   ;;  %s1323_s12 = smov (!%p316_p9), 127  }
  0x12   : > { %v460_v20 = vpack.i.b16 (!%p316_p9), %v459_v13, %v459_v13  ;;  %v453_v21 = vpack.i.b16 (!%p316_p9), %v452_v17, %v452_v17  ;;  %v512_v26 = vshrl.u32 (!%p316_p9), %v1115_v4, 16  ;;  %v505_v27 = vshrl.u32 (!%p316_p9), %v1114_v3, 16 }
  0x13   : > { %v1445_v11 = vrot.slane (!%p316_p9), %v390_v6, %v394_v8  ;;  %v1454_v14 = vrot.slane (!%p316_p9), %v397_v9, %v394_v8  ;;  %v1466_v28 = vrot.slane (!%p316_p9), %v418_v22, %v415_v19  ;;  %v1468_v29 = vrot.slane (!%p316_p9), %v411_v23, %v415_v19 }
  0x14   : > { %v465_v24 = vrot.slane (!%p316_p9), %v460_v20, %v415_v19  ;;  %v458_v25 = vrot.slane (!%p316_p9), %v453_v21, %v415_v19  ;;  %v513_v30 = vpack.i.b16 (!%p316_p9), %v512_v26, %v512_v26  ;;  %v506_v31 = vpack.i.b16 (!%p316_p9), %v505_v27, %v505_v27 }
  0x15   : > { %s354_s29 = scalar_select %p353_p10, %s1410_s17, 1  ;;  %428 = vrot.lane.b32.xlu0 %v1445_v11, %s1314_s20  ;;  %440 = vrot.lane.b32.xlu1 %v1445_v11, %s1315_s21  ;;  %vm485_vm3 = vcmask 130048   ;;  %vm444_vm4 = vcmask 15360   ;;  %vm525_vm5 = vcmask 261120   ;;  %vm548_vm6 = vcmask 269312  }
  0x16   : > { %v518_v32 = vrot.slane %v513_v30, %v394_v8  ;;  %v511_v33 = vrot.slane %v506_v31, %v394_v8  ;;  %vm560_vm7 = vcmask 277504   ;;  %vm591_vm8 = vcmask 1039360  }
  0x17   : > { %s1137_s30 = sshll.u32 %s354_s29, 3  ;;  %s1320_s29 = smov 33   ;;  %vm606_vm9 = vcmask 1031168   ;;  %vm699_vm10 = vcmask 1043456   ;;  %vm692_vm11 = vcmask 1041408   ;;  %vm621_vm12 = vcmask 916480  }
  0x18   : > { %s357_s18 = scalar_lea.vmem %s1667_s0, %s1137_s30  ;;  %s1321_s30 = smov 34   ;;  %vm632_vm13 = vcmask 908288   ;;  %vm647_vm14 = vcmask 900096   ;;  %vm704_vm15 = vcmask 1045504  }
  0x19   : > { %v1450_v12 = vld [vmem:[%s357_s18] sm:$0xff]  ;;  %442 = vrot.lane.b32.xlu1 %v1454_v14, %s1315_s21  ;;  %s1324_s18 = smov 126  }
  0x1a   : > { %v363_v15 = vpack.c.bf16 %v1450_v12, %v1450_v12  ;;  %v1460_v16 = vcombine.high %v1450_v12, %v1450_v12 }
  0x1c   : > { %367 = vrot.lane.b32.xlu0 %v363_v15, %s1316_s25  ;;  %v364_v18 = vpack.c.bf16 %v1460_v16, %v1460_v16 }
  0x1d   : > { %430 = vrot.lane.b32.xlu1 %v1454_v14, %s1314_s20  ;;  %s1325_s20 = smov 112  }
  0x20   : > { %369 = vrot.lane.b32.xlu0 %v364_v18, %s1316_s25  ;;  %s1327_s25 = smov 96  }
  0x21   : > { %470 = vrot.lane.b32.xlu1 %v465_v24, %s1315_s21 }
  0x24   : > { %468 = vrot.lane.b32.xlu0 %v458_v25, %s1315_s21  ;;  %s1326_s21 = smov 110  }
  0x25   : > { %483 = vrot.lane.b32.xlu1 %v1466_v28, %s1317_s26 }
  0x28   : > { %481 = vrot.lane.b32.xlu0 %v1468_v29, %s1317_s26  ;;  %s1328_s26 = smov 95  }
  0x29   : > { %523 = vrot.lane.b32.xlu1 %v518_v32, %s1318_s27 }
  0x2c   : > { %521 = vrot.lane.b32.xlu0 %v511_v33, %s1318_s27 }
  0x2d   : > { %495 = vrot.lane.b32.xlu1 %v465_v24, %s1319_s28 }
  0x30   : > { %493 = vrot.lane.b32.xlu0 %v458_v25, %s1319_s28  ;;  %s1138_s28 = sshll.u32 %s1410_s17, 7  ;;  %s1333_s17 = smov [#allocation2]  }
  0x31   : > { %535 = vrot.lane.b32.xlu1 %v1466_v28, %s1318_s27 }
  0x34   : > { %533 = vrot.lane.b32.xlu0 %v1468_v29, %s1318_s27  ;;  %s1329_s27 = smov 94  }
  0x35   : > { %546 = vrot.lane.b32.xlu1 %v518_v32, %s1320_s29 }
  0x38   : > { %544 = vrot.lane.b32.xlu0 %v511_v33, %s1320_s29 }
  0x39   : > { %558 = vrot.lane.b32.xlu1 %v518_v32, %s1321_s30 }
  0x3c   : > { %556 = vrot.lane.b32.xlu0 %v511_v33, %s1321_s30 }
  0x3d   : > { %570 = vrot.lane.b32.xlu1 %v465_v24, %s1321_s30 }
  0x40   : > { %568 = vrot.lane.b32.xlu0 %v458_v25, %s1321_s30 }
  0x87   : > { %v429_v34 = vpop.permute.xlu0 %428  ;;  %v441_v35 = vpop.permute.xlu1 %440 }
  0x8b   : > { %v1474_v36 = vpop.permute.xlu1 %442 }
  0x8c   : > { %v445_v10 = vsel %vm444_vm4, %v441_v35, %v1474_v36 }
  0x8e   : > { %v368_v37 = vpop.permute.xlu0 %367 }
  0x8f   : > { %v1476_v38 = vsel %vm371_vm0, 0, %v368_v37  ;;  %v431_v39 = vpop.permute.xlu1 %430 }
  0x90   : > { %626 = vrot.lane.b32.xlu1 %v1476_v38, %s1322_s11  ;;  %v437_v41 = vmul.bf16 %v429_v34, %v1476_v38  ;;  %v449_v45 = vmul.bf16 %v441_v35, %v1476_v38  ;;  %v433_v60 = vsel %vm432_vm1, %v429_v34, %v431_v39  ;;  %vm662_vm1 = vcmask 785408  }
  0x92   : > { %v370_v40 = vpop.permute.xlu0 %369  ;;  %v582_v48 = vrot.slane %v437_v41, 6 }
  0x93   : > { %v1480_v42 = vsel %vm371_vm0, %v368_v37, %v370_v40  ;;  %v1482_v43 = vsel %vm371_vm0, %v370_v40, 0  ;;  %v1488_v46 = vpop.permute.xlu1 %470  ;;  %vm677_vm0 = vcmask 777216  }
  0x94   : > { %630 = vrot.lane.b32.xlu0 %v1482_v43, %s1322_s11  ;;  %628 = vrot.lane.b32.xlu1 %v1480_v42, %s1322_s11  ;;  %v439_v44 = vmul.bf16 %v431_v39, %v1482_v43  ;;  %v438_v4 = vmul.bf16 %v433_v60, %v1480_v42  ;;  %v450_v22 = vmul.bf16 %v445_v10, %v1480_v42 }
  0x95   : > { %v451_v33 = vmul.bf16 %v1474_v36, %v1482_v43 }
  0x96   : > { %v469_v47 = vpop.permute.xlu0 %468  ;;  %v584_v49 = vrot.slane %v439_v44, 6  ;;  %v583_v17 = vrot.slane %v438_v4, 6 }
  0x97   : > { %v476_v50 = vmul.bf16 %v469_v47, %v449_v45  ;;  %v484_v52 = vpop.permute.xlu1 %483  ;;  %v472_v19 = vsel %vm444_vm4, %v469_v47, %v1488_v46  ;;  %v478_v41 = vmul.bf16 %v1488_v46, %v451_v33  ;;  %vm746_vm4 = vcmask 293888  }
  0x98   : > { %585 = vrot.lane.b32.xlu0 %v582_v48, %s1323_s12  ;;  %589 = vrot.lane.b32.xlu1 %v584_v49, %s1323_s12  ;;  %v492_v54 = vmul.bf16 %v484_v52, %v1482_v43  ;;  %v477_v27 = vmul.bf16 %v472_v19, %v450_v22  ;;  %v403_v19 = vmul.bf16 %v1445_v11, %v1476_v38 }
  0x99   : > { %v597_v51 = vrot.slane %v476_v50, 4  ;;  %v599_v50 = vrot.slane %v478_v41, 4 }
  0x9a   : > { %v482_v53 = vpop.permute.xlu0 %481  ;;  %v614_v56 = vrot.slane %v492_v54, 2  ;;  %v598_v39 = vrot.slane %v477_v27, 4 }
  0x9b   : > { %v490_v55 = vmul.bf16 %v482_v53, %v1476_v38  ;;  %v1495_v58 = vpop.permute.xlu1 %523  ;;  %v486_v5 = vsel %vm485_vm3, %v482_v53, %v484_v52 }
  0x9c   : > { %600 = vrot.lane.b32.xlu1 %v597_v51, %s1324_s18  ;;  %v491_v13 = vmul.bf16 %v486_v5, %v1480_v42  ;;  %v532_v48 = vmul.bf16 %v1495_v58, %v1482_v43 }
  0x9d   : > { %v612_v57 = vrot.slane %v490_v55, 2 }
  0x9e   : > { %v522_v59 = vpop.permute.xlu0 %521  ;;  %v613_v23 = vrot.slane %v491_v13, 2 }
  0x9f   : > { %615 = vrot.lane.b32.xlu0 %v612_v57, %s1325_s20  ;;  %v496_v61 = vpop.permute.xlu1 %495  ;;  %v530_v2 = vmul.bf16 %v522_v59, %v1476_v38  ;;  %v526_v24 = vsel %vm525_vm5, %v522_v59, %v1495_v58 }
  0xa0   : > { %619 = vrot.lane.b32.xlu1 %v614_v56, %s1325_s20  ;;  %v504_v25 = vmul.bf16 %v496_v61, %v1482_v43  ;;  %v531_v32 = vmul.bf16 %v526_v24, %v1480_v42  ;;  %v1330_v56 = vmov 0   ;;  %v424_v24 = vmul.bf16 %v1468_v29, %v403_v19 }
  0xa1   : > { %788 = vmatprep.mubr.bf16.mxu0 %v1330_v56  ;;  %1213 = vset.pattern.permute.xlu0 %v1330_v56 }
  0xa2   : > { %v494_v62 = vpop.permute.xlu0 %493  ;;  %v640_v34 = vrot.slane %v504_v25, 6  ;;  %1214 = vset.pattern.permute.xlu1 %v1330_v56 }
  0xa3   : > { %v498_v63 = vsel %vm497_vm2, %v494_v62, %v496_v61  ;;  %v502_v0 = vmul.bf16 %v494_v62, %v1476_v38  ;;  %v536_v7 = vpop.permute.xlu1 %535  ;;  %vm689_vm2 = vcmask 769024  }
  0xa4   : > { %v503_v1 = vmul.bf16 %v498_v63, %v1480_v42  ;;  %v543_v51 = vmul.bf16 %v536_v7, %v532_v48  ;;  %v729_v63 = vld [vmem:[%s1670_s3] sm:$0xff] }
  0xa5   : > { %v638_v3 = vrot.slane %v502_v0, 6 }
  0xa6   : > { %v639_v6 = vrot.slane %v503_v1, 6  ;;  %v534_v8 = vpop.permute.xlu0 %533  ;;  %v655_v54 = vrot.slane %v543_v51, 4 }
  0xa7   : > { %v541_v9 = vmul.bf16 %v534_v8, %v530_v2  ;;  %641 = vrot.lane.b32.xlu0 %v638_v3, %s1326_s21  ;;  %v547_v18 = vpop.permute.xlu1 %546  ;;  %v537_v31 = vsel %vm525_vm5, %v534_v8, %v536_v7  ;;  %vm1332_vm5 = vmmov 0  }
  0xa8   : > { %643 = vrot.lane.b32.xlu1 %v639_v6, %s1326_s21  ;;  %v555_v20 = vmul.bf16 %v547_v18, %v1482_v43  ;;  %v542_v40 = vmul.bf16 %v537_v31, %v531_v32 }
  0xa9   : > { %v653_v15 = vrot.slane %v541_v9, 4 }
  0xaa   : > { %v545_v21 = vpop.permute.xlu0 %544  ;;  %v670_v26 = vrot.slane %v555_v20, 2  ;;  %v654_v47 = vrot.slane %v542_v40, 4 }
  0xab   : > { %587 = vrot.lane.b32.xlu0 %v583_v17, %s1323_s12  ;;  %v549_v30 = vsel %vm548_vm6, %v545_v21, %v547_v18  ;;  %v559_v45 = vpop.permute.xlu1 %558  ;;  %v553_v55 = vmul.bf16 %v545_v21, %v1476_v38  ;;  %v404_v21 = vmul.bf16 %v1454_v14, %v1480_v42  ;;  %vm899_vm6 = vcmask 64512  }
  0xac   : > { %656 = vrot.lane.b32.xlu1 %v653_v15, %s1327_s25  ;;  %v554_v35 = vmul.bf16 %v549_v30, %v1480_v42  ;;  %v567_v46 = vmul.bf16 %v559_v45, %v1482_v43  ;;  %v730_v43 = vld [vmem:[%s1670_s3 + $0x8] sm:$0xff] }
  0xad   : > { %v668_v59 = vrot.slane %v553_v55, 2  ;;  %v425_v27 = vmul.bf16 %v1466_v28, %v404_v21 }
  0xae   : > { %v557_v37 = vpop.permute.xlu0 %556  ;;  %v669_v44 = vrot.slane %v554_v35, 2 }
  0xaf   : > { %617 = vrot.lane.b32.xlu0 %v613_v23, %s1325_s20  ;;  %v565_v36 = vmul.bf16 %v557_v37, %v1476_v38  ;;  %v571_v53 = vpop.permute.xlu1 %570  ;;  %v561_v58 = vsel %vm560_vm7, %v557_v37, %v559_v45 }
  0xb0   : > { %675 = vrot.lane.b32.xlu1 %v670_v26, %s1328_s26  ;;  %v578_v57 = vmul.bf16 %v571_v53, %v567_v46  ;;  %v566_v61 = vmul.bf16 %v561_v58, %v1480_v42 }
  0xb2   : > { %v569_v49 = vpop.permute.xlu0 %568 }
  0xb3   : > { %645 = vrot.lane.b32.xlu0 %v640_v34, %s1326_s21  ;;  %v576_v52 = vmul.bf16 %v569_v49, %v565_v36  ;;  %v572_v60 = vsel %vm560_vm7, %v569_v49, %v571_v53 }
  0xb4   : > { %602 = vrot.lane.b32.xlu1 %v598_v39, %s1324_s18  ;;  %v577_v62 = vmul.bf16 %v572_v60, %v566_v61  ;;  %v1220_v60 = vld [vmem:[%s1669_s2] sm:$0xff]  }
  0xb7   : > { %673 = vrot.lane.b32.xlu0 %v669_v44, %s1328_s26 }
  0xb8   : > { %658 = vrot.lane.b32.xlu1 %v654_v47, %s1327_s25 }
  0xbb   : > { %604 = vrot.lane.b32.xlu0 %v599_v50, %s1324_s18  ;;  %s1625_s18 = scalar_lea.hbm %s1677_s10, %s1138_s28 }
  0xbc   : > { %683 = vrot.lane.b32.xlu1 %v576_v52, %s1329_s27 }
  0xbf   : > { %660 = vrot.lane.b32.xlu0 %v655_v54, %s1327_s25  ;;  %s1254_s25 = sshll.u32 %s1333_s17, 4  ;;  %s1255_s25 = int_to_ptr.vmem [resolvable:$false] %s1254_s25 }
  0xc0   : > { %687 = vrot.lane.b32.xlu1 %v578_v57, %s1329_s27 }
  0xc3   : > { %671 = vrot.lane.b32.xlu0 %v668_v59, %s1328_s26  ;;  %s350_s26 = sand.u32 1, %s1304_s14  }
  0xc4   : > { %738 = vperm.xlu1 %1214, %v730_v43   ;;  %s1034_s20 = scalar_lea.sflag [#allocation3], %s350_s26 }
  0xc7   : > { %685 = vrot.lane.b32.xlu0 %v577_v62, %s1329_s27  ;;  %s1111_s27 = sshll.u32 %s350_s26, 3 }
  0xc8   : > { %s352_s29 = scalar_lea.vmem [#allocation2], %s1111_s27  ;;  %s1256_s27 = scalar_lea.vmem %s1255_s25, 256 }
  0xc9   : > { %s1048_s30 = sshll.u32 %s352_s29, 4  ;;  %s1627_s30 = int_to_ptr.vmem [resolvable:$true] %s1048_s30 }
  0xca   : > { %s1250_s21 = scalar_lea.vmem %s1627_s30, 128  ;;  %p1257_p0 = scmp.lt.s32.totalorder %s1627_s30, %s1255_s25 }
  0xcb   : > { %733 = vperm.xlu0 %1213, %v729_v63   ;;  %p1251_p11 = scmp.ne.s32.totalorder %s1627_s30, %s1250_s21  ;;  %p1258_p1 = scmp.lt.s32.totalorder %s1256_s27, %s1250_s21 }
  0xcd   : > { %p1252_p12 = pnand %p1251_p11, %p1427_p5  ;;  %p1259_p2 = por %p1258_p1, %p1257_p0 }
  0xcf   : > { %p1253_p13 = pneg %p1252_p12 }
  0xd1   : > { %p1260_p3 = pnand %p1259_p2, %p1253_p13 }
 0x102   : > { %v627_v0 = vpop.permute.xlu1 %626 }
 0x106   : > { %v629_v1 = vpop.permute.xlu1 %628  ;;  %v631_v3 = vpop.permute.xlu0 %630 }
 0x107   : > { %v634_v35 = vsel %vm632_vm13, %v629_v1, %v631_v3  ;;  %v633_v36 = vsel %vm632_vm13, %v627_v0, %v629_v1 }
 0x10a   : > { %v590_v2 = vpop.permute.xlu1 %589  ;;  %v586_v5 = vpop.permute.xlu0 %585 }
 0x10e   : > { %v601_v4 = vpop.permute.xlu1 %600 }
 0x111   : > { %v616_v6 = vpop.permute.xlu0 %615 }
 0x112   : > { %v620_v7 = vpop.permute.xlu1 %619 }
 0x119   : > { %v642_v8 = vpop.permute.xlu0 %641 }
 0x11a   : > { %v644_v9 = vpop.permute.xlu1 %643 }
 0x11b   : > { %v648_v40 = vsel %vm647_vm14, %v642_v8, %v644_v9 }
 0x11c   : > { %v713_v51 = vsel %vm692_vm11, %v633_v36, %v648_v40 }
 0x11d   : > { %v588_v10 = vpop.permute.xlu0 %587 }
 0x11e   : > { %v657_v13 = vpop.permute.xlu1 %656  ;;  %v592_v23 = vsel %vm591_vm8, %v586_v5, %v588_v10  ;;  %v593_v25 = vsel %vm591_vm8, %v588_v10, %v590_v2 }
 0x11f   : > { %v695_v11 = vsel %vm692_vm11, %v424_v24, %v592_v23  ;;  %v698_v14 = vsel %vm692_vm11, %v425_v27, %v593_v25 }
 0x121   : > { %v618_v15 = vpop.permute.xlu0 %617 }
 0x122   : > { %v676_v17 = vpop.permute.xlu1 %675  ;;  %v623_v31 = vsel %vm621_vm12, %v618_v15, %v620_v7  ;;  %v622_v28 = vsel %vm621_vm12, %v616_v6, %v618_v15 }
 0x125   : > { %v646_v18 = vpop.permute.xlu0 %645 }
 0x126   : > { %v603_v20 = vpop.permute.xlu1 %602  ;;  %v649_v32 = vsel %vm647_vm14, %v644_v9, %v646_v18 }
 0x127   : > { %v607_v26 = vsel %vm606_vm9, %v601_v4, %v603_v20  ;;  %v716_v41 = vsel %vm692_vm11, %v634_v35, %v649_v32  ;;  %v837_v35 = vld [vmem:[%s1672_s5] sm:$0xff] }
 0x128   : > { %v701_v29 = vsel %vm699_vm10, %v695_v11, %v607_v26 }
 0x129   : > { %v674_v22 = vpop.permute.xlu0 %673  ;;  %v706_v39 = vsel %vm704_vm15, %v701_v29, %v622_v28 }
 0x12a   : > { %v659_v38 = vpop.permute.xlu1 %658  ;;  %v679_v45 = vsel %vm677_vm0, %v674_v22, %v676_v17 }
 0x12b   : > { %v663_v47 = vsel %vm662_vm1, %v657_v13, %v659_v38 }
 0x12c   : > { %v718_v46 = vsel %vm699_vm10, %v713_v51, %v663_v47 }
 0x12d   : > { %v605_v30 = vpop.permute.xlu0 %604 }
 0x12e   : > { %v608_v42 = vsel %vm606_vm9, %v603_v20, %v605_v30  ;;  %v684_v48 = vpop.permute.xlu1 %683 }
 0x12f   : > { %v703_v33 = vsel %vm699_vm10, %v698_v14, %v608_v42  ;;  %v1331_v42 = vmov 0.0  }
 0x130   : > { %v709_v34 = vsel %vm704_vm15, %v703_v33, %v623_v31  ;;  %1143 = vmatprep.subr.bf16.mxu1 %v1331_v42  ;;  %1145 = vmatprep.mubr.msk.bf16.mxu1 %vm1332_vm5, %v1331_v42 }
 0x131   : > { %756 = vmatprep.subr.bf16.mxu0 %v709_v34  ;;  %v661_v37 = vpop.permute.xlu0 %660  ;;  %v835_v34 = vld [vmem:[%s1671_s4] sm:$0xf] }
 0x132   : > { %v664_v44 = vsel %vm662_vm1, %v659_v38, %v661_v37  ;;  %757 = vmatpush1.bf16.msra.mxu0 %v706_v39  ;;  %v688_v55 = vpop.permute.xlu1 %687 }
 0x133   : > { %v720_v49 = vsel %vm699_vm10, %v716_v41, %v664_v44 }
 0x134   : > { %v725_v50 = vsel %vm704_vm15, %v720_v49, %v679_v45 }
 0x135   : > { %758 = vmatprep.subr.bf16.mxu0 %v725_v50  ;;  %v672_v52 = vpop.permute.xlu0 %671 }
 0x136   : > { %v678_v53 = vsel %vm677_vm0, %v672_v52, %v674_v22  ;;  %v1221_v52 = vld [vmem:[%s1673_s6] sm:$0xff]  }
 0x137   : > { %v722_v54 = vsel %vm704_vm15, %v718_v46, %v678_v53  ;;  %v892_v53 = vld [vmem:[%s1674_s7] sm:$0xff] }
 0x138   : > { %759 = vmatpush1.bf16.msra.mxu0 %v722_v54  ;;  %v893_v54 = vld [vmem:[%s1674_s7 + $0x8] sm:$0xff] }
 0x139   : > { %v686_v57 = vpop.permute.xlu0 %685 }
 0x13a   : > { %v690_v58 = vsel %vm689_vm2, %v684_v48, %v686_v57  ;;  %v691_v59 = vsel %vm689_vm2, %v686_v57, %v688_v55 }
 0x13b   : > { %1119 = vmatprep.subr.msk.bf16.mxu0 %vm692_vm11, %v691_v59  ;;  %v751_v43 = vsel %vm692_vm11, %v690_v58, 0 }
 0x13c   : > { %761 = vmatpush1.bf16.msra.mxu0 %v751_v43 }
 0x13f   : > { %1120 = vmatmul.mubr.msk.bf16.vlgmr.msra.gmra.mrb[0].mxu0 %vm746_vm4, %v1220_v60 }
 0x140   : > { %1017 = vmatprep.mubr.bf16.mxu0 %v1330_v56 }
 0x143   : > { %v739_v63 = vpop.permute.xlu1 %738 }
 0x14a   : > { %v734_v61 = vpop.permute.xlu0 %733 }
 0x212   : > { %v790_v62 = vpop.f32.mrb[0].mxu0 }
 0x213   : > { %v791_v0 = vadd.f32 %v790_v62, %v734_v61  ;;  %v792_v1 = vpop.f32.mrb[1].mxu0 }
 0x214   : > { %v793_v2 = vadd.f32 %v792_v1, %v734_v61  ;;  %v794_v3 = vpop.f32.mrb[2].mxu0 }
 0x215   : > { %v1121_v4 = vmul.f32 -1.442695, %v791_v0  ;;  %v795_v5 = vadd.f32 %v794_v3, %v739_v63  ;;  %v796_v6 = vpop.f32.mrb[3].mxu0 }
 0x216   : > { %v1122_v7 = vmul.f32 -1.442695, %v793_v2  ;;  %v797_v8 = vadd.f32 %v796_v6, %v739_v63 }
 0x217   : > { %1222 = vpow2.f32 %v1121_v4  ;;  %v1123_v9 = vmul.f32 -1.442695, %v795_v5  ;;  %v976_v4 = vld [vmem:[%s1676_s9] sm:$0xf] }
 0x218   : > { %1224 = vpow2.f32 %v1122_v7  ;;  %v1124_v10 = vmul.f32 -1.442695, %v797_v8 }
 0x219   : > { %1226 = vpow2.f32 %v1123_v9 }
 0x21a   : > { %1228 = vpow2.f32 %v1124_v10 }
 0x221   : > { %v1223_v13 = vpop.eup %1222 }
 0x222   : > { %v1225_v56 = vpop.eup %1224  ;;  %v811_v15 = vadd.f32 1.0, %v1223_v13 }
 0x223   : > { %v1227_v17 = vpop.eup %1226  ;;  %v812_v18 = vadd.f32 1.0, %v1225_v56 }
 0x224   : > { %v1229_v19 = vpop.eup %1228  ;;  %1230 = vrcp.f32 %v811_v15  ;;  %v813_v20 = vadd.f32 1.0, %v1227_v17  ;;  %v973_v15 = vld [vmem:[%s1675_s8] sm:$0x3] }
 0x225   : > { %1232 = vrcp.f32 %v812_v18  ;;  %v814_v21 = vadd.f32 1.0, %v1229_v19 }
 0x226   : > { %1234 = vrcp.f32 %v813_v20 }
 0x227   : > { %1236 = vrcp.f32 %v814_v21 }
 0x22e   : > { %v1231_v22 = vpop.eup %1230 }
 0x22f   : > { %v1233_v23 = vpop.eup %1232  ;;  %v1578_v24 = vmul.f32 %v1231_v22, %v791_v0 }
 0x230   : > { %v1235_v25 = vpop.eup %1234  ;;  %v1580_v26 = vmul.f32 %v1233_v23, %v793_v2 }
 0x231   : > { %v1237_v27 = vpop.eup %1236  ;;  %v1582_v11 = vmul.f32 %v1235_v25, %v795_v5 }
 0x232   : > { %v1584_v38 = vmul.f32 %v1237_v27, %v797_v8  ;;  %v827_v30 = vadd.f32 %v1580_v26, %v1578_v24 }
 0x234   : > { %828 = vadd.xlane.f32.xlu1 %v827_v30  ;;  %v830_v14 = vadd.f32 %v1584_v38, %v1582_v11 }
 0x236   : > { %831 = vadd.xlane.f32.xlu0 %v830_v14 }
 0x2c1   : > { %v829_v29 = vpop.xlane.xlu1 %828 }
 0x2c2   : > { %v833_v32 = vmul.f32 0.00390625, %v829_v29 }
 0x2c3   : > { %v832_v31 = vpop.xlane.xlu0 %831 }
 0x2c4   : > { %v834_v33 = vmul.f32 0.00390625, %v832_v31 }
 0x2c6   : > { %v836_v28 = vpack.c.bf16 %v834_v33, %v833_v32 }
 0x2c8   : > { %1144 = vmatpush3.bf16.msra.mxu1 %v836_v28 }
 0x2c9   : > { %1149 = vmatprep.subr.bf16.mxu1 %v1331_v42 }
 0x2cb   : > { %1146 = vmatmul.mubr.msk.bf16.vlgmr.msra.gmra.mrb[0].mxu1 %vm485_vm3, %v835_v34 }
 0x2cc   : > { %1151 = vmatprep.mubr.msk.bf16.mxu1 %vm1332_vm5, %v1331_v42 }
 0x39e   : > { %v876_v37 = vpop.f32.mrb[0].mxu1 }
 0x39f   : > { %v877_v39 = vadd.f32 %v876_v37, %v837_v35  ;;  %v1147_v40 = vpop.f32.mrb[1].mxu1 }
 0x3a0   : > { %v879_v41 = vpop.f32.mrb[2].mxu1 }
 0x3a1   : > { %v1126_v44 = vmul.f32 -1.442695, %v877_v39  ;;  %v1148_v45 = vpop.f32.mrb[3].mxu1 }
 0x3a3   : > { %1238 = vpow2.f32 %v1126_v44 }
 0x3ad   : > { %v1239_v47 = vpop.eup %1238 }
 0x3ae   : > { %v885_v48 = vadd.f32 1.0, %v1239_v47 }
 0x3b0   : > { %1240 = vrcp.f32 %v885_v48 }
 0x3ba   : > { %v1241_v49 = vpop.eup %1240 }
 0x3bb   : > { %v888_v36 = vmul.f32 %v1241_v49, %v877_v39 }
 0x3bd   : > { %v891_v50 = vpack.c.bf16 %v888_v36, %v888_v36 }
 0x3bf   : > { %v904_v51 = vsel %vm699_vm10, %v891_v50, 0 }
 0x3c0   : > { %1150 = vmatpush3.bf16.msra.mxu1 %v904_v51 }
 0x3c3   : > { %1152 = vmatmul.mubr.msk.bf16.vlgmr.msra.gmra.mrb[4].mxu1 %vm899_vm6, %v1221_v52 }
 0x496   : > { %v940_v46 = vpop.f32.mrb[4].mxu1 }
 0x497   : > { %v941_v55 = vadd.f32 %v940_v46, %v892_v53  ;;  %v1153_v57 = vpop.f32.mrb[5].mxu1 }
 0x498   : > { %v943_v58 = vpop.f32.mrb[6].mxu1 }
 0x499   : > { %v1129_v59 = vmul.f32 -1.442695, %v941_v55  ;;  %v944_v43 = vadd.f32 %v943_v58, %v893_v54  ;;  %v1154_v60 = vpop.f32.mrb[7].mxu1 }
 0x49b   : > { %1242 = vpow2.f32 %v1129_v59  ;;  %v1130_v61 = vmul.f32 -1.442695, %v944_v43 }
 0x49d   : > { %1244 = vpow2.f32 %v1130_v61 }
 0x4a5   : > { %v1243_v62 = vpop.eup %1242 }
 0x4a6   : > { %v953_v63 = vadd.f32 1.0, %v1243_v62 }
 0x4a7   : > { %v1245_v0 = vpop.eup %1244 }
 0x4a8   : > { %1246 = vrcp.f32 %v953_v63  ;;  %v954_v1 = vadd.f32 1.0, %v1245_v0 }
 0x4aa   : > { %1248 = vrcp.f32 %v954_v1 }
 0x4b2   : > { %v1247_v2 = vpop.eup %1246 }
 0x4b3   : > { %961 = vperm.xlu0 %1213, %v1247_v2  }
 0x4b4   : > { %v1249_v3 = vpop.eup %1248 }
 0x4b5   : > { %966 = vperm.xlu1 %1214, %v1249_v3  }
 0x4b9   : > { %979 = vperm.xlu1 %1214, %v976_v4  }
 0x532   : > { %v962_v5 = vpop.permute.xlu0 %961 }
 0x533   : > { %v969_v7 = vmul.f32 %v962_v5, %v1578_v24  ;;  %v970_v8 = vmul.f32 %v962_v5, %v1580_v26 }
 0x534   : > { %v967_v6 = vpop.permute.xlu1 %966 }
 0x535   : > { %v971_v9 = vmul.f32 %v967_v6, %v1582_v11  ;;  %v972_v10 = vmul.f32 %v967_v6, %v1584_v38 }
 0x537   : > { %v974_v13 = vpack.c.bf16 %v971_v9, %v969_v7  ;;  %v975_v56 = vpack.c.bf16 %v972_v10, %v970_v8 }
 0x538   : > { %v980_v17 = vpop.permute.xlu1 %979 }
 0x539   : > { %985 = vmatprep.subr.bf16.mxu0 %v975_v56 }
 0x53a   : > { %986 = vmatpush1.bf16.msra.mxu0 %v974_v13 }
 0x53d   : > { %1131 = vmatmul.mubr.msk.bf16.vlgmr.msra.gmra.mrb[4].mxu0 %vm485_vm3, %v973_v15 }
 0x610   : > { %v1019_v18 = vpop.f32.mrb[4].mxu0 }
 0x611   : > { %v1020_v19 = vadd.f32 %v1019_v18, %v980_v17  ;;  %v1021_v20 = vpop.f32.mrb[5].mxu0 }
 0x612   : > { %v1022_v21 = vadd.f32 %v1021_v20, %v980_v17  ;;  %v1023_v22 = vpop.f32.mrb[6].mxu0 }
 0x613   : > { %v1026_v23 = vadd.f32 %v1020_v19, %v1450_v12  ;;  %v1024_v24 = vpop.f32.mrb[7].mxu0 }
 0x614   : > { %v1027_v25 = vadd.f32 %v1022_v21, %v1460_v16 }
 0x616   : > { %v1030_v26 = vcombine.low %v1026_v23, %v1027_v25 }
 0x618   : > { %1032 = vst [vmem:[%s352_s29] sm:$0xff] %v1030_v26 }
 0x619   : > { %1263 = shalt.err (!%p1260_p3)
}
 0x61a   : > { %s1264_s26 = scalar_lea.hbm %s1625_s18, 128  ;;  %s1268_s11 = scalar_lea.hbm %s1677_s10, 256 }
 0x61b   : > { %p1265_p4 = scmp.ne.s32.totalorder %s1625_s18, %s1264_s26  ;;  %p1269_p9 = scmp.lt.u32.totalorder %s1625_s18, %s1677_s10 }
 0x61c   : > { %p1270_p10 = scmp.lt.u32.totalorder %s1268_s11, %s1264_s26  ;;  %p1272_p12 = scmp.lt.u32.totalorder %s1264_s26, %s1625_s18 }
 0x61d   : > { %p1266_p7 = pnand %p1265_p4, %p1427_p5 }
 0x61e   : > { %p1271_p11 = por %p1270_p10, %p1269_p9 }
 0x61f   : > { %p1267_p8 = pneg %p1266_p7 }
 0x620   : > { %p1273_p13 = por %p1272_p12, %p1271_p11 }
 0x622   : > { %p1274_p0 = pnand %p1273_p13, %p1267_p8 }
 0x624   : > { %1277 = shalt.err (!%p1274_p0)
}
 0x625   : > { %1155 = dma.vmem_to_hbm [thread:$0]  (%p1427_p5), %s1627_s30, 128, %s1625_s18, %s1034_s20  }
 0x626 PF: > { %p1161_p1 = scmp.ge.s32.totalorder %s1312_s16, 2  ;;  %s1060_s21 = sand.u32 1, %s1300_s13  }
 0x627   : > { %s1061_s25 = scalar_lea.sflag [#allocation3], %s1060_s21 }
 0x628   : > { %p1158_p2 = pnand %p1161_p1, %p1431_p6 }
 0x62a   : > { %1295 = dma.done.wait (!%p1158_p2), %s1061_s25, 128  }
 0x62b   : > { %1297 = vsyncadd (!%p1158_p2), %s1061_s25, 4294967168  ;;  %p20_p3 = scmp.ge.s32.totalorder %s1414_s19, 4   ;;  %s1680_s13 = smov %s1304_s14 }
 0x62c   : > { %s1681_s14 = smov %s1308_s15  ;;  %s1682_s15 = smov %s1425_s22 }
 0x62d   : > { %s1683_s16 = smov %s1414_s19  ;;  %22 = sbr.rel (!%p20_p3) target bundleno = 3 (0x3), region = 95 }
 0x634   :  { %1066 = vsyncpa [#allocation3], 1 }
 0x635   :  { %1068 = vsyncpa [#allocation3 + $0x1], 1 }

</bundles_post_ra>
